<compile_context>
chip_gen: v7x
topology: tpu7x:2x2x1
jax: 0.10.0
libtpu: 0.0.40
codegen_flags: <defaults>
</compile_context>

<pallas_src>
import functools
import math

import jax
import jax.numpy as jnp
from jax.experimental import pallas as pl
from jax.experimental.pallas import tpu as pltpu


def _round_up(x, m):
    return (x + m - 1) // m * m


def _device_kind():
    try:
        return jax.devices()[0].device_kind.lower()
    except Exception:
        return ""


def _pick_oc_tile(o_real):
    # v6e/v7x MXUs are 2x256x256 -> 256-wide output-channel tiles when the layer is wide
    # enough; v5e (128-wide MXU) and unknown chips keep 128.
    kind = _device_kind()
    wide_mxu = any(tag in kind for tag in ("v6", "v7", "7x"))
    return 256 if (wide_mxu and _round_up(o_real, 128) >= 256) else 128


def _vmem_capacity_bytes():
    try:
        return int(pltpu.get_tpu_info().vmem_capacity_bytes)
    except Exception:
        kind = _device_kind()
        return (64 << 20) if ("v7" in kind or "7x" in kind) else (128 << 20)


# ----------------------------------------------------------------------------- kernel

def _conv_bias_lrelu_kernel(x_ref, w_ref, b_ref, o_ref, *,
                            khb, kwb, th, ow, cs, row_axis, neg_slope):
    """One (image, output-row tile, output-channel tile) grid step.

    x_ref : (1, Hs, Ws, Cs)   bf16  space-to-depth'd zero-padded input plane (VMEM)
    w_ref : (Ktot, TO)        bf16  tap-folded, spectrally-normalized weight tile
    b_ref : (1, TO)           f32   bias tile
    o_ref : (1, TH, OW, TO)   bf16  output row/channel tile (lane-dense store)
    """
    t = pl.program_id(row_axis)
    row0 = t * th                      # first s2d row needed by this output-row tile

    # Fused im2col: each tap-block is a unit-stride window of the s2d plane.  All taps are
    # folded into the contraction axis -> ONE MXU dot with K = khb*kwb*Cs (no per-tap
    # tiny-K matmuls, no f32 VPU accumulate passes).
    chunks = []
    for r0 in range(khb):
        for q0 in range(kwb):
            chunks.append(x_ref[0, pl.ds(row0 + r0, th), pl.ds(q0, ow), :])
    lhs = chunks[0] if len(chunks) == 1 else jnp.concatenate(chunks, axis=-1)
    lhs = lhs.reshape(th * ow, khb * kwb * cs)

    acc = jnp.dot(lhs, w_ref[...], preferred_element_type=jnp.float32)

    # Fused epilogue: bias + LeakyReLU (vmul+vmax), bf16 writeback.
    acc = acc + b_ref[...]
    acc = jnp.maximum(acc, neg_slope * acc)
    o_ref[...] = acc.reshape(1, th, ow, o_ref.shape[3]).astype(o_ref.dtype)


# ----------------------------------------------------------------------------- wrapper

def conv2d_leaky_relu(x_nhwc, w_oihw, bias, *, stride, padding, neg_slope=0.2):
    """Conv2d(bias=True) + LeakyReLU(neg_slope) on an NHWC input.

    Returns the channel-padded NHWC bf16 activation; channels [..., :dim_out] are real.
    The caller folds the un-pad into its next layout op so the padded tensor never makes
    a separate HBM round trip.
    """
    n, h, w, c = x_nhwc.shape
    o, ci, kh, kw = w_oihw.shape
    assert c == ci, (c, ci)
    s = stride
    oh = (h + 2 * padding - kh) // s + 1
    ow = (w + 2 * padding - kw) // s + 1
    hp, wp = h + 2 * padding, w + 2 * padding

    # ---- output-channel tiling (generation dependent) ----
    t_o = _pick_oc_tile(o)
    o_pad = _round_up(o, t_o)
    n_oc = o_pad // t_o

    # ---- space-to-depth: fold the stride phases into channels so every tap is a
    #      unit-stride window and the contraction depth grows to s*s*C ----
    hp2, wp2 = _round_up(hp, s), _round_up(wp, s)
    hs, ws, cs = hp2 // s, wp2 // s, s * s * c
    khb, kwb = -(-kh // s), -(-kw // s)         # tap blocks per spatial dim
    ktot = khb * kwb * cs

    # pad + bf16 cast (+ s2d relayout) fuse into a single XLA pass over the input.
    xp = jnp.pad(x_nhwc, ((0, 0), (padding, padding + hp2 - hp),
                          (padding, padding + wp2 - wp), (0, 0))).astype(jnp.bfloat16)
    if s == 1:
        xs = xp
    else:
        xs = xp.reshape(n, hs, s, ws, s, c).transpose(0, 1, 3, 2, 4, 5)
        xs = xs.reshape(n, hs, ws, cs)

    # tap-folded weights: row order = (tap-block R0,Q0) x (phase ph,pw) x C, matching the
    # kernel's lane-concat order; phantom taps (s not dividing kh/kw) are zero rows.
    khp, kwp = khb * s, kwb * s
    w_p = jnp.pad(w_oihw, ((0, 0), (0, 0), (0, khp - kh), (0, kwp - kw)))
    w_r = w_p.transpose(2, 3, 1, 0)                                    # (khp, kwp, C, O)
    w_r = w_r.reshape(khb, s, kwb, s, c, o).transpose(0, 2, 1, 3, 4, 5)
    w_r = w_r.reshape(ktot, o)
    w_r = jnp.pad(w_r, ((0, 0), (0, o_pad - o))).astype(jnp.bfloat16)
    b_p = jnp.pad(bias.astype(jnp.float32), (0, o_pad - o)).reshape(1, o_pad)

    # ---- output-row tiling: keep the dot's M = TH*OW at <= 128 rows so the f32 result
    #      tile stays <= 16 vregs (the tap reduction now lives inside the single dot,
    #      so nothing is carried across an unrolled loop) ----
    th = 1
    for cand in range(1, oh + 1):
        if oh % cand == 0 and cand * ow <= 128:
            th = cand
    n_rt = oh // th

    # ---- grid ordering: weight tiles outermost when the weight slab is the big operand;
    #      otherwise batch outermost.  The x plane's block index is constant across the
    #      inner axes, so it is DMA'd once per image either way. ----
    x_blk_bytes = hs * ws * cs * 2
    w_blk_bytes = ktot * t_o * 2
    weights_outer = (n_oc > 1) and (w_blk_bytes * n_oc > x_blk_bytes)
    if weights_outer:
        grid = (n_oc, n, n_rt)
        row_axis = 2
        x_map = lambda j, b, t: (b, 0, 0, 0)
        w_map = lambda j, b, t: (0, j)
        s_map = lambda j, b, t: (0, j)
        o_map = lambda j, b, t: (b, t, 0, j)
    else:
        grid = (n, n_rt, n_oc)
        row_axis = 1
        x_map = lambda b, t, j: (b, 0, 0, 0)
        w_map = lambda b, t, j: (0, j)
        s_map = lambda b, t, j: (0, j)
        o_map = lambda b, t, j: (b, t, 0, j)

    kernel = functools.partial(
        _conv_bias_lrelu_kernel, khb=khb, kwb=kwb, th=th, ow=ow, cs=cs,
        row_axis=row_axis, neg_slope=neg_slope)

    # ---- VMEM budget from the actual pipeline (double-buffered blocks + live matmul
    #      operands), capped against this generation's physical capacity ----
    out_blk_bytes = th * ow * t_o * 2
    live_bytes = th * ow * (ktot * 2 + t_o * 4)          # bf16 lhs + f32 dot result
    pipeline_bytes = (2 * (x_blk_bytes + w_blk_bytes + t_o * 4 + out_blk_bytes)
                      + live_bytes)
    vmem_limit = int(min(max(2 * pipeline_bytes, 8 << 20),
                         int(0.6 * _vmem_capacity_bytes())))

    # advisory cost on the REAL work (no o_pad / ktot zero-padding inflation).
    flops = 2 * n * oh * ow * kh * kw * c * o
    bytes_accessed = (n * hs * ws * cs * 2 + kh * kw * c * o * 2 + o * 4
                      + n * oh * ow * o * 2)

    return pl.pallas_call(
        kernel,
        out_shape=jax.ShapeDtypeStruct((n, oh, ow, o_pad), jnp.bfloat16),
        grid_spec=pltpu.PrefetchScalarGridSpec(
            num_scalar_prefetch=0,
            grid=grid,
            in_specs=[
                pl.BlockSpec((1, hs, ws, cs), x_map),
                pl.BlockSpec((ktot, t_o), w_map),
                pl.BlockSpec((1, t_o), s_map),
            ],
            out_specs=pl.BlockSpec((1, th, ow, t_o), o_map),
        ),
        compiler_params=pltpu.CompilerParams(
            dimension_semantics=("parallel", "parallel", "parallel"),
            vmem_limit_bytes=vmem_limit),
        cost_estimate=pl.CostEstimate(
            flops=flops, transcendentals=0, bytes_accessed=bytes_accessed),
    )(xs, w_r, b_p)


# ----------------------------------------------------------------------------- module

def _spectral_normalize(w, u, n_power_iterations=1, eps=1e-12):
    """torch.nn.utils.spectral_norm weight (train-mode: 1-step power iteration)."""
    o = w.shape[0]
    w_mat = w.reshape(o, -1)
    v = None
    for _ in range(n_power_iterations):
        v = w_mat.T @ u
        v = v / jnp.maximum(jnp.linalg.norm(v), eps)
        u = w_mat @ v
        u = u / jnp.maximum(jnp.linalg.norm(u), eps)
    sigma = u @ (w_mat @ v)
    return w / sigma


def init_conv2d_params(key, dim_in, dim_out, kernel_size):
    """PyTorch Conv2d default init (kaiming_uniform a=sqrt(5) => U(+-1/sqrt(fan_in)))."""
    k_w, k_b, k_u = jax.random.split(key, 3)
    fan_in = dim_in * kernel_size * kernel_size
    bound = 1.0 / math.sqrt(fan_in)
    w = jax.random.uniform(k_w, (dim_out, dim_in, kernel_size, kernel_size),
                           jnp.float32, -bound, bound)
    b = jax.random.uniform(k_b, (dim_out,), jnp.float32, -bound, bound)
    u = jax.random.normal(k_u, (dim_out,), jnp.float32)
    u = u / jnp.maximum(jnp.linalg.norm(u), 1e-12)
    return {"w": w, "b": b, "u": u}


def conv2d_forward_nhwc(params, x_nhwc, *, stride, padding, negative_slope=0.2):
    """NHWC-native forward (preferred inside a network: no layout transposes).
    Returns channel-padded bf16 NHWC; real channels are [..., :dim_out]."""
    # spectral norm is two tiny matvecs -> plain jnp in the wrapper (not worth a kernel)
    w_sn = _spectral_normalize(params["w"], params["u"])
    return conv2d_leaky_relu(x_nhwc, w_sn, params["b"], stride=stride,
                             padding=padding, neg_slope=negative_slope)


def conv2d_forward(params, x_nchw, *, stride, padding, negative_slope=0.2):
    """Forward of: spectral_norm(nn.Conv2d(...)) -> LeakyReLU(0.2). NCHW in/out (PyTorch parity)."""
    o = params["w"].shape[0]
    x = jnp.transpose(x_nchw, (0, 2, 3, 1))                       # NCHW -> NHWC
    y = conv2d_forward_nhwc(params, x, stride=stride, padding=padding,
                            negative_slope=negative_slope)
    # channel un-pad + NHWC->NCHW + f32 cast folded into ONE consumer pass
    # (no separate full-output slice pass over the padded tensor).
    return jnp.transpose(y[..., :o], (0, 3, 1, 2)).astype(jnp.float32)


def reference_forward(params, x_nchw, *, stride, padding, negative_slope=0.2):
    """Pure-JAX (XLA) reference of the same forward, for a tolerance check."""
    w_sn = _spectral_normalize(params["w"], params["u"])
    y = jax.lax.conv_general_dilated(
        x_nchw.astype(jnp.float32), w_sn,
        window_strides=(stride, stride),
        padding=[(padding, padding), (padding, padding)],
        dimension_numbers=("NCHW", "OIHW", "NCHW"))
    y = y + params["b"][None, :, None, None]
    return jnp.where(y >= 0.0, y, negative_slope * y)


# ----------------------------------------------------------------------------- main

if __name__ == "__main__":
    key = jax.random.PRNGKey(0)
    k1, k2, k3, k4 = jax.random.split(key, 4)

    # Case 1: 3x3 / stride 1 / pad 1 conv, NCHW input (2, 4, 16, 16).
    params1 = init_conv2d_params(k1, dim_in=4, dim_out=32, kernel_size=3)
    x1 = jax.random.normal(k2, (2, 4, 16, 16), jnp.float32)
    fwd1 = jax.jit(functools.partial(conv2d_forward, stride=1, padding=1))
    out1 = jax.block_until_ready(fwd1(params1, x1))
    ref1 = reference_forward(params1, x1, stride=1, padding=1)
    assert out1.shape == (2, 32, 16, 16), out1.shape
    assert out1.dtype == jnp.float32
    assert bool(jnp.all(jnp.isfinite(out1)))
    err1 = float(jnp.max(jnp.abs(out1 - ref1)))
    scale1 = float(jnp.max(jnp.abs(ref1)))
    assert err1 <= 0.05 * scale1 + 1e-3, (err1, scale1)

    # Case 2: 4x4 / stride 2 / pad 1 downsampling conv (stride handled via space-to-depth).
    params2 = init_conv2d_params(k3, dim_in=32, dim_out=64, kernel_size=4)
    x2 = jax.random.normal(k4, (2, 32, 16, 16), jnp.float32)
    fwd2 = jax.jit(functools.partial(conv2d_forward, stride=2, padding=1))
    out2 = jax.block_until_ready(fwd2(params2, x2))
    ref2 = reference_forward(params2, x2, stride=2, padding=1)
    assert out2.shape == (2, 64, 8, 8), out2.shape
    assert bool(jnp.all(jnp.isfinite(out2)))
    err2 = float(jnp.max(jnp.abs(out2 - ref2)))
    scale2 = float(jnp.max(jnp.abs(ref2)))
    assert err2 <= 0.05 * scale2 + 1e-3, (err2, scale2)

    print("KERNEL_OK")
</pallas_src>

<mosaic_0001>
module attributes {stable_mosaic.version = 11 : i64} {
  func.func @_conv_bias_lrelu_kernel(%arg0: i32, %arg1: i32, %arg2: i32, %arg3: memref<1x18x18x4xbf16, #tpu.memory_space<vmem>>, %arg4: memref<36x128xbf16, #tpu.memory_space<vmem>>, %arg5: memref<1x128xf32, #tpu.memory_space<vmem>>, %arg6: memref<1x8x16x128xbf16, #tpu.memory_space<vmem>>) attributes {dimension_semantics = [#tpu.dimension_semantics<parallel>, #tpu.dimension_semantics<parallel>, #tpu.dimension_semantics<parallel>], iteration_bounds = array<i64: 2, 2, 1>, scalar_prefetch = 0 : i64, scratch_operands = 0 : i64, tpu.core_type = #tpu.core_type<tc>, window_params = [{transform_indices = @transform_0, window_bounds = array<i64: 1, 18, 18, 4>}, {transform_indices = @transform_1, window_bounds = array<i64: 36, 128>}, {transform_indices = @transform_2, window_bounds = array<i64: 1, 128>}, {transform_indices = @transform_3, window_bounds = array<i64: 1, 8, 16, 128>}]} {
    %c8_i32 = arith.constant 8 : i32
    %0 = arith.muli %arg1, %c8_i32 : i32
    %c0_i32 = arith.constant 0 : i32
    %1 = arith.addi %0, %c0_i32 : i32
    %c0 = arith.constant 0 : index
    %2 = arith.index_cast %1 : i32 to index
    %c0_0 = arith.constant 0 : index
    %c0_1 = arith.constant 0 : index
    %3 = vector.load %arg3[%c0, %2, %c0_0, %c0_1] : memref<1x18x18x4xbf16, #tpu.memory_space<vmem>>, vector<1x8x16x4xbf16>
    %4 = vector.shape_cast %3 : vector<1x8x16x4xbf16> to vector<8x16x4xbf16>
    %c0_i32_2 = arith.constant 0 : i32
    %5 = arith.addi %0, %c0_i32_2 : i32
    %c0_3 = arith.constant 0 : index
    %6 = arith.index_cast %5 : i32 to index
    %c1 = arith.constant 1 : index
    %c0_4 = arith.constant 0 : index
    %7 = vector.load %arg3[%c0_3, %6, %c1, %c0_4] : memref<1x18x18x4xbf16, #tpu.memory_space<vmem>>, vector<1x8x16x4xbf16>
    %8 = vector.shape_cast %7 : vector<1x8x16x4xbf16> to vector<8x16x4xbf16>
    %c0_i32_5 = arith.constant 0 : i32
    %9 = arith.addi %0, %c0_i32_5 : i32
    %c0_6 = arith.constant 0 : index
    %10 = arith.index_cast %9 : i32 to index
    %c2 = arith.constant 2 : index
    %c0_7 = arith.constant 0 : index
    %11 = vector.load %arg3[%c0_6, %10, %c2, %c0_7] : memref<1x18x18x4xbf16, #tpu.memory_space<vmem>>, vector<1x8x16x4xbf16>
    %12 = vector.shape_cast %11 : vector<1x8x16x4xbf16> to vector<8x16x4xbf16>
    %c1_i32 = arith.constant 1 : i32
    %13 = arith.addi %0, %c1_i32 : i32
    %c0_8 = arith.constant 0 : index
    %14 = arith.index_cast %13 : i32 to index
    %c0_9 = arith.constant 0 : index
    %c0_10 = arith.constant 0 : index
    %15 = vector.load %arg3[%c0_8, %14, %c0_9, %c0_10] : memref<1x18x18x4xbf16, #tpu.memory_space<vmem>>, vector<1x8x16x4xbf16>
    %16 = vector.shape_cast %15 : vector<1x8x16x4xbf16> to vector<8x16x4xbf16>
    %c1_i32_11 = arith.constant 1 : i32
    %17 = arith.addi %0, %c1_i32_11 : i32
    %c0_12 = arith.constant 0 : index
    %18 = arith.index_cast %17 : i32 to index
    %c1_13 = arith.constant 1 : index
    %c0_14 = arith.constant 0 : index
    %19 = vector.load %arg3[%c0_12, %18, %c1_13, %c0_14] : memref<1x18x18x4xbf16, #tpu.memory_space<vmem>>, vector<1x8x16x4xbf16>
    %20 = vector.shape_cast %19 : vector<1x8x16x4xbf16> to vector<8x16x4xbf16>
    %c1_i32_15 = arith.constant 1 : i32
    %21 = arith.addi %0, %c1_i32_15 : i32
    %c0_16 = arith.constant 0 : index
    %22 = arith.index_cast %21 : i32 to index
    %c2_17 = arith.constant 2 : index
    %c0_18 = arith.constant 0 : index
    %23 = vector.load %arg3[%c0_16, %22, %c2_17, %c0_18] : memref<1x18x18x4xbf16, #tpu.memory_space<vmem>>, vector<1x8x16x4xbf16>
    %24 = vector.shape_cast %23 : vector<1x8x16x4xbf16> to vector<8x16x4xbf16>
    %c2_i32 = arith.constant 2 : i32
    %25 = arith.addi %0, %c2_i32 : i32
    %c0_19 = arith.constant 0 : index
    %26 = arith.index_cast %25 : i32 to index
    %c0_20 = arith.constant 0 : index
    %c0_21 = arith.constant 0 : index
    %27 = vector.load %arg3[%c0_19, %26, %c0_20, %c0_21] : memref<1x18x18x4xbf16, #tpu.memory_space<vmem>>, vector<1x8x16x4xbf16>
    %28 = vector.shape_cast %27 : vector<1x8x16x4xbf16> to vector<8x16x4xbf16>
    %c2_i32_22 = arith.constant 2 : i32
    %29 = arith.addi %0, %c2_i32_22 : i32
    %c0_23 = arith.constant 0 : index
    %30 = arith.index_cast %29 : i32 to index
    %c1_24 = arith.constant 1 : index
    %c0_25 = arith.constant 0 : index
    %31 = vector.load %arg3[%c0_23, %30, %c1_24, %c0_25] : memref<1x18x18x4xbf16, #tpu.memory_space<vmem>>, vector<1x8x16x4xbf16>
    %32 = vector.shape_cast %31 : vector<1x8x16x4xbf16> to vector<8x16x4xbf16>
    %c2_i32_26 = arith.constant 2 : i32
    %33 = arith.addi %0, %c2_i32_26 : i32
    %c0_27 = arith.constant 0 : index
    %34 = arith.index_cast %33 : i32 to index
    %c2_28 = arith.constant 2 : index
    %c0_29 = arith.constant 0 : index
    %35 = vector.load %arg3[%c0_27, %34, %c2_28, %c0_29] : memref<1x18x18x4xbf16, #tpu.memory_space<vmem>>, vector<1x8x16x4xbf16>
    %36 = vector.shape_cast %35 : vector<1x8x16x4xbf16> to vector<8x16x4xbf16>
    %37 = tpu.concatenate %4, %8, %12, %16, %20, %24, %28, %32, %36 in 2 : vector<8x16x4xbf16>, vector<8x16x4xbf16>, vector<8x16x4xbf16>, vector<8x16x4xbf16>, vector<8x16x4xbf16>, vector<8x16x4xbf16>, vector<8x16x4xbf16>, vector<8x16x4xbf16>, vector<8x16x4xbf16> -> vector<8x16x36xbf16>
    %38 = vector.shape_cast %37 : vector<8x16x36xbf16> to vector<128x36xbf16>
    %c0_30 = arith.constant 0 : index
    %c0_31 = arith.constant 0 : index
    %39 = vector.load %arg4[%c0_30, %c0_31] : memref<36x128xbf16, #tpu.memory_space<vmem>>, vector<36x128xbf16>
    %cst = arith.constant dense<0.000000e+00> : vector<128x128xf32>
    %40 = tpu.matmul %38, %39, %cst {dimension_numbers = #tpu.dot_dimension_numbers<[1], [0], [0], [1], [0, 0, 1, 1], [], []>} : vector<128x36xbf16>, vector<36x128xbf16>, vector<128x128xf32> -> vector<128x128xf32>
    %c0_32 = arith.constant 0 : index
    %c0_33 = arith.constant 0 : index
    %41 = vector.load %arg5[%c0_32, %c0_33] : memref<1x128xf32, #tpu.memory_space<vmem>>, vector<1x128xf32>
    %42 = vector.broadcast %41 : vector<1x128xf32> to vector<128x128xf32>
    %43 = arith.addf %40, %42 : vector<128x128xf32>
    %cst_34 = arith.constant 2.000000e-01 : f32
    %44 = vector.broadcast %cst_34 : f32 to vector<128x128xf32>
    %45 = arith.mulf %44, %43 : vector<128x128xf32>
    %46 = arith.maximumf %43, %45 : vector<128x128xf32>
    %47 = vector.shape_cast %46 : vector<128x128xf32> to vector<1x8x16x128xf32>
    %48 = arith.truncf %47 : vector<1x8x16x128xf32> to vector<1x8x16x128xbf16>
    %c0_35 = arith.constant 0 : index
    %c0_36 = arith.constant 0 : index
    %c0_37 = arith.constant 0 : index
    %c0_38 = arith.constant 0 : index
    %49 = vector.load %arg6[%c0_35, %c0_36, %c0_37, %c0_38] : memref<1x8x16x128xbf16, #tpu.memory_space<vmem>>, vector<1x8x16x128xbf16>
    tpu.vector_store %arg6[%c0_35, %c0_36, %c0_37, %c0_38], %48 {strides = array<i32>} : memref<1x8x16x128xbf16, #tpu.memory_space<vmem>>, vector<1x8x16x128xbf16>,
    return
  }
  func.func @transform_0(%arg0: i32, %arg1: i32, %arg2: i32) -> (i32, i32, i32, i32) {
    %c0_i32 = arith.constant 0 : i32
    %c0_i32_0 = arith.constant 0 : i32
    %c0_i32_1 = arith.constant 0 : i32
    %c0_i32_2 = arith.constant 0 : i32
    return %arg0, %c0_i32, %c0_i32_0, %c0_i32_1 : i32, i32, i32, i32
  }
  func.func @transform_1(%arg0: i32, %arg1: i32, %arg2: i32) -> (i32, i32) {
    %c0_i32 = arith.constant 0 : i32
    %c0_i32_0 = arith.constant 0 : i32
    return %c0_i32, %arg2 : i32, i32
  }
  func.func @transform_2(%arg0: i32, %arg1: i32, %arg2: i32) -> (i32, i32) {
    %c0_i32 = arith.constant 0 : i32
    %c0_i32_0 = arith.constant 0 : i32
    return %c0_i32, %arg2 : i32, i32
  }
  func.func @transform_3(%arg0: i32, %arg1: i32, %arg2: i32) -> (i32, i32, i32, i32) {
    %c0_i32 = arith.constant 0 : i32
    %c0_i32_0 = arith.constant 0 : i32
    return %arg0, %arg1, %c0_i32, %arg2 : i32, i32, i32, i32
  }
}

</mosaic_0001>

<bundles_post_ra>
// kernel: conv2d_forward.1
= control target key start
LH: loop header
LB: loop body
LE: loop exit
PB: predicated region body
PF: predicated region fallthrough
CT: control target
= control target key end

     0   :  { %s2120_s12 = smov 0   ;;  %s2122_s13 = smov 0   ;;  %s2706_s0 = inlined_call_operand.vmem [shape: bf16[2,18,18,4], index: 0, kind: input, shape index: {}]   ;;  %s2707_s1 = inlined_call_operand.vmem [shape: bf16[36,128], index: 1, kind: input, shape index: {}]   ;;  %s2708_s2 = inlined_call_operand.vmem [shape: f32[1,128], index: 2, kind: input, shape index: {}]   ;;  %s2709_s3 = inlined_call_operand.vmem [shape: bf16[2,16,16,128], index: 3, kind: output, shape index: {}]  }
   0x1   :  { %s2124_s14 = smov 0   ;;  %s2126_s15 = smov 0  }
   0x2   :  { %s2128_s16 = smov 0  }
   0x3 LB: > { %s28_s17 = sadd.s32 1, %s2082_s14  ;;  %s32_s18 = sadd.s32 1, %s2086_s15  ;;  %s2090_s16 = sphi %s2128_s16, %s13_s16   ;;  %s2086_s15 = sphi %s2126_s15, %s2713_s15   ;;  %s2082_s14 = sphi %s2124_s14, %s2712_s14   ;;  %s2078_s13 = sphi %s2122_s13, %s2711_s13   ;;  %s2074_s12 = sphi %s2120_s12, %s2710_s12  }
   0x4   : > { %p30_p0 = scmp.ge.s32.totalorder %s28_s17, 2  ;;  %p1644_p1 = scmp.ge.s32.totalorder %s2090_s16, 1 }
   0x5   : > { %p177_p2 = scmp.lt.s32.totalorder %s2090_s16, 5 }
   0x6   : > { %s2715_s17 = smov (%p30_p0, %s28_s17), 0  ;;  %s2717_s18 = smov (!%p30_p0, %s32_s18), %s2086_s15 }
   0x7   : > { %p178_p3 = pnand %p1644_p1, %p177_p2  ;;  %p34_p4 = scmp.ge.s32.totalorder %s2717_s18, 2 }
   0x8   : > { %p216_p5 = scmp.lt.s32.totalorder (!%p178_p3), %s2078_s13, 1  ;;  %s1823_s19 = smul.u32 (!%p178_p3), 96, %s2074_s12  ;;  %vm552_vm0 = vcmask (!%p178_p3), 1046528   ;;  %vm415_vm1 = vsmask.f32 (!%p178_p3), 7424  ;;  %vm1285_vm2 = vcmask (!%p178_p3), 1041408  }
   0x9   : > { %s2719_s18 = smov (%p34_p4, %s2717_s18), 0  ;;  %181 = sbr.rel (%p178_p3) target bundleno = 491 (0x1eb), region = 32 }
   0xa   : > { %s2092_s25 = smov (!%p178_p3), 12   ;;  %s2093_s26 = smov (!%p178_p3), 8   ;;  %vm1105_vm3 = vcmask (!%p178_p3), 31744   ;;  %vm1122_vm4 = vcmask (!%p178_p3), 64512   ;;  %vm1139_vm5 = vcmask (!%p178_p3), 97280   ;;  %vm1156_vm6 = vcmask (!%p178_p3), 130048  }
   0xb   : > { %s2094_s27 = smov (!%p178_p3), 4   ;;  %s2095_s28 = smov (!%p178_p3), 16   ;;  %vm1173_vm7 = vcmask (!%p178_p3), 162816   ;;  %vm1190_vm8 = vcmask (!%p178_p3), 195584   ;;  %vm1207_vm9 = vcmask (!%p178_p3), 228352   ;;  %vm1224_vm10 = vcmask (!%p178_p3), 261120  }
   0xc   : > { %s2096_s29 = smov (!%p178_p3), 20   ;;  %s2097_s5 = smov (!%p178_p3), 24   ;;  %vm1268_vm11 = vcmask (!%p178_p3), 293888  }
   0xd   : > { %s2098_s8 = smov (!%p178_p3), 28   ;;  %s2099_s9 = smov (!%p178_p3), 32  }
  0x10   : > { %s2721_s13 = smov (!%p216_p5, %s2078_s13), 1 }
  0x11   : > { %s1928_s20 = smul.u32 216, %s2721_s13 }
  0x13   : > { %s220_s23 = scalar_lea.vmem %s2706_s0, %s1928_s20 }
  0x14   : > { %s2159_s24 = scalar_lea.vmem %s220_s23, %s1823_s19  ;;  %s1646_s19 = sshll.u32 %s2074_s12, 3 }
  0x15   : > { %v1663_v0 = vld [vmem:[%s2159_s24 + $0x3c] sm:$0xf]  ;;  %v2163_v1 = vld [vmem:[%s2159_s24 + $0x40] sm:$0xf]  ;;  %v1655_v3 = vld [vmem:[%s2159_s24 + $0xc] sm:$0xf] }
  0x16   : > { %v2166_v2 = vcombine.low %v1663_v0, %v2163_v1  ;;  %v2170_v4 = vld [vmem:[%s2159_s24 + $0x10] sm:$0xf]  ;;  %v256_v6 = vld [vmem:[%s2159_s24 + $0x34] sm:$0xf]  ;;  %v248_v12 = vld [vmem:[%s2159_s24 + $0x4] sm:$0xf] }
  0x17   : > { %v2173_v5 = vcombine.low %v1655_v3, %v2170_v4  ;;  %v275_v7 = vld [vmem:[%s2159_s24 + $0x30] sm:$0xe]  ;;  %v2180_v8 = vld [vmem:[%s2159_s24 + $0x38] ss:$0 sps:$4 sm:$0x11]   ;;  %p231_p6 = scmp.lt.s32.totalorder %s1646_s19, 15 }
  0x18   : > { %641 = vrot.lane.b32.xlu1 %v2166_v2, %s2092_s25  ;;  %v1741_v9 = vcombine.low %v275_v7, %v256_v6  ;;  %v255_v10 = vld [vmem:[%s2159_s24 + $0x30] sm:$0xf]  ;;  %v724_v11 = vshll.u32 %v2166_v2, 16  ;;  %v566_v14 = vrot.slane %v2180_v8, 1  ;;  %v271_v15 = vld [vmem:[%s2159_s24] sm:$0xe] }
  0x19   : > { %633 = vrot.lane.b32.xlu0 %v2173_v5, %s2092_s25  ;;  %v247_v16 = vld [vmem:[%s2159_s24] sm:$0xf]  ;;  %v676_v17 = vshll.u32 %v2173_v5, 16  ;;  %v2191_v18 = vcombine.low %v255_v10, %v256_v6  ;;  %v1984_v19 = vld [vmem:[%s2159_s24 + $0x8] ss:$0 sps:$4 sm:$0x11]   ;;  %v1737_v20 = vcombine.low %v271_v15, %v248_v12 }
  0x1a   : > { %v565_v13 = vrot.slane %v1741_v9, 1  ;;  %v257_v21 = vld [vmem:[%s2159_s24 + $0x3c] sm:$0xf]  ;;  %v2196_v23 = vcombine.low %v247_v16, %v248_v12  ;;  %v258_v24 = vld [vmem:[%s2159_s24 + $0x40] sm:$0xf]  ;;  %v554_v27 = vrot.slane %v1984_v19, 1 }
  0x1b   : > { %v276_v25 = vld [vmem:[%s2159_s24 + $0x3c] sm:$0xe]  ;;  %v553_v26 = vrot.slane %v1737_v20, 1  ;;  %v1988_v28 = vld [vmem:[%s2159_s24 + $0x44] ss:$0 sps:$4 sm:$0x11]   ;;  %v2203_v31 = vcombine.low %v257_v21, %v258_v24 }
  0x1c   : > { %v567_v22 = vsel %vm552_vm0, %v565_v13, %v566_v14  ;;  %v1742_v29 = vcombine.low %v276_v25, %v258_v24  ;;  %v465_v30 = vshrl.u32 %v2191_v18, 16  ;;  %v249_v32 = vld [vmem:[%s2159_s24 + $0xc] sm:$0xf]  ;;  %v250_v33 = vld [vmem:[%s2159_s24 + $0x10] sm:$0xf]  ;;  %v569_v36 = vrot.slane %v1988_v28, 1 }
  0x1d   : > { %585 = vrot.lane.b32.xlu1 %v567_v22, %s2093_s26  ;;  %v555_v34 = vsel %vm552_vm0, %v553_v26, %v554_v27  ;;  %v272_v37 = vld [vmem:[%s2159_s24 + $0xc] sm:$0xe]  ;;  %v2209_v38 = vcombine.low %v249_v32, %v250_v33  ;;  %v1991_v39 = vld [vmem:[%s2159_s24 + $0x14] ss:$0 sps:$4 sm:$0x11]   ;;  %v417_v41 = vshrl.u32 %v2196_v23, 16 }
  0x1e   : > { %v568_v35 = vrot.slane %v1742_v29, 1  ;;  %577 = vrot.lane.b32.xlu0 %v555_v34, %s2093_s26  ;;  %v1738_v40 = vcombine.low %v272_v37, %v250_v33  ;;  %v419_v42 = vshll.u32 %v2196_v23, 16  ;;  %v424_v43 = vshll.u32 %v1984_v19, 16  ;;  %v1665_v52 = vld [vmem:[%s2159_s24 + $0x48] sm:$0xf]  ;;  %s2723_s19 = smov (!%p231_p6, %s1646_s19), 15 }
  0x1f   : > { %v429_v45 = vshrl.u32 %v2209_v38, 16  ;;  %v431_v46 = vshll.u32 %v2209_v38, 16  ;;  %v477_v47 = vshrl.u32 %v2203_v31, 16  ;;  %v557_v49 = vrot.slane %v1991_v39, 1  ;;  %v2223_v57 = vld [vmem:[%s2159_s24 + $0x4c] sm:$0xf] }
  0x20   : > { %v570_v44 = vsel %vm552_vm0, %v568_v35, %v569_v36  ;;  %v556_v48 = vrot.slane %v1738_v40, 1  ;;  %v436_v50 = vshll.u32 %v1991_v39, 16  ;;  %v421_v51 = vrot.slane %v419_v42, 1  ;;  %v1657_v62 = vld [vmem:[%s2159_s24 + $0x18] sm:$0xf]  ;;  %s1647_s22 = sshll.u32 %s2723_s19, 1 }
  0x21   : > { %587 = vrot.lane.b32.xlu1 %v570_v44, %s2093_s26  ;;  %v433_v53 = vrot.slane %v431_v46, 1  ;;  %v426_v54 = vrot.slane %v424_v43, 1  ;;  %v479_v55 = vshll.u32 %v2203_v31, 16  ;;  %v484_v56 = vshll.u32 %v1988_v28, 16  ;;  %v2229_v63 = vld [vmem:[%s2159_s24 + $0x1c] sm:$0xf] }
  0x22   : > { %v558_v58 = vsel %vm552_vm0, %v556_v48, %v557_v49  ;;  %v438_v59 = vrot.slane %v436_v50, 1  ;;  %v422_v60 = vor.u32 %v421_v51, %v417_v41  ;;  %v467_v61 = vshll.u32 %v2191_v18, 16  ;;  %v2236_v13 = vld [vmem:[%s2159_s24 + $0x44] ss:$0 sps:$4 sm:$0x11]   ;;  %s1648_s23 = sshll.u32 %s2721_s13, 5 }
  0x23   : > { %579 = vrot.lane.b32.xlu0 %v558_v58, %s2093_s26  ;;  %v434_v0 = vor.u32 %v433_v53, %v429_v45  ;;  %v481_v3 = vrot.slane %v479_v55, 1  ;;  %v486_v6 = vrot.slane %v484_v56, 1  ;;  %v472_v7 = vshll.u32 %v2180_v8, 16  ;;  %v2241_v20 = vld [vmem:[%s2159_s24 + $0x14] ss:$0 sps:$4 sm:$0x11]   ;;  %s238_s12 = sadd.s32 %s1648_s23, %s1647_s22 }
  0x24   : > { %v427_v9 = vsel %vm415_vm1, %v422_v60, %v426_v54  ;;  %v469_v10 = vrot.slane %v467_v61, 1  ;;  %v1750_v12 = vcombine.low %v1665_v52, %v2223_v57  ;;  %v1746_v19 = vcombine.low %v1657_v62, %v2229_v63  ;;  %v2248_v24 = vld [vmem:[%s2159_s24 + $0x50] ss:$0 sps:$4 sm:$0x11]   ;;  %v1683_v40 = vld [vmem:[%s2159_s24 + $0x3c] sm:$0xe] }
  0x25   : > { %v439_v14 = vsel %vm415_vm1, %v434_v0, %v438_v59  ;;  %v482_v15 = vor.u32 %v481_v3, %v477_v47  ;;  %v474_v16 = vrot.slane %v472_v7, 1  ;;  %v722_v21 = vshrl.u32 %v2166_v2, 16  ;;  %v1679_v43 = vld [vmem:[%s2159_s24 + $0xc] sm:$0xe]  ;;  %v1684_v49 = vld [vmem:[%s2159_s24 + $0x48] sm:$0xe] }
  0x26   : > { %514 = vrot.lane.b32.xlu1 %v439_v14, %s2094_s27  ;;  %v470_v8 = vor.u32 %v469_v10, %v465_v30  ;;  %v726_v22 = vrot.slane %v724_v11, 1  ;;  %v736_v26 = vshll.u32 %v1750_v12, 16  ;;  %v729_v27 = vshll.u32 %v2236_v13, 16  ;;  %v2259_v11 = vld [vmem:[%s2159_s24 + $0x20] ss:$0 sps:$4 sm:$0x11]  }
  0x27   : > { %512 = vrot.lane.b32.xlu0 %v427_v9, %s2094_s27  ;;  %v487_v25 = vsel %vm415_vm1, %v482_v15, %v486_v6  ;;  %v674_v28 = vshrl.u32 %v2173_v5, 16  ;;  %v688_v30 = vshll.u32 %v1746_v19, 16  ;;  %v678_v32 = vrot.slane %v676_v17, 1  ;;  %v1680_v53 = vld [vmem:[%s2159_s24 + $0x18] sm:$0xe]  ;;  %s1649_s13 = sshll.u32 %s238_s12, 2 }
  0x28   : > { %v475_v29 = vsel %vm415_vm1, %v470_v8, %v474_v16  ;;  %v681_v2 = vshll.u32 %v2241_v20, 16  ;;  %v727_v33 = vor.u32 %v726_v22, %v722_v21  ;;  %v731_v34 = vrot.slane %v729_v27, 1  ;;  %v1697_v54 = vld [vmem:[%s2159_s24 + $0x48] sm:$0xf]  ;;  %v1689_v55 = vld [vmem:[%s2159_s24 + $0x18] sm:$0xf] }
  0x29   : > { %v679_v35 = vor.u32 %v678_v32, %v674_v28  ;;  %v734_v36 = vshrl.u32 %v1750_v12, 16  ;;  %v738_v37 = vrot.slane %v736_v26, 1  ;;  %v741_v39 = vshll.u32 %v2248_v24, 16  ;;  %v2286_v60 = vld [vmem:[%s2159_s24 + $0x1c] sm:$0xf] }
  0x2a   : > { %522 = vrot.lane.b32.xlu1 %v487_v25, %s2094_s27  ;;  %v683_v5 = vrot.slane %v681_v2, 1  ;;  %v686_v17 = vshrl.u32 %v1746_v19, 16  ;;  %v690_v41 = vrot.slane %v688_v30, 1  ;;  %v693_v42 = vshll.u32 %v2259_v11, 16  ;;  %v1699_v7 = vld [vmem:[%s2159_s24 + $0x54] sm:$0xf] }
  0x2b   : > { %520 = vrot.lane.b32.xlu0 %v475_v29, %s2094_s27  ;;  %v1765_v44 = vcombine.low %v1683_v40, %v2163_v1  ;;  %v732_v45 = vsel %vm415_vm1, %v727_v33, %v731_v34  ;;  %v739_v46 = vor.u32 %v738_v37, %v734_v36  ;;  %v743_v47 = vrot.slane %v741_v39, 1  ;;  %v2278_v1 = vld [vmem:[%s2159_s24 + $0x4c] sm:$0xf]  ;;  %v2296_v9 = vld [vmem:[%s2159_s24 + $0x58] sm:$0xf] }
  0x2c   : > { %v1761_v48 = vcombine.low %v1679_v43, %v2170_v4  ;;  %v684_v50 = vsel %vm415_vm1, %v679_v35, %v683_v5  ;;  %v691_v51 = vor.u32 %v690_v41, %v686_v17  ;;  %v695_v52 = vrot.slane %v693_v42, 1  ;;  %v2303_v14 = vld [vmem:[%s2159_s24 + $0x28] sm:$0xf]  ;;  %v2309_v21 = vld [vmem:[%s2159_s24 + $0x50] ss:$0 sps:$4 sm:$0x11]  }
  0x2d   : > { %v1766_v56 = vcombine.low %v1684_v49, %v2223_v57  ;;  %v744_v4 = vsel %vm415_vm1, %v739_v46, %v743_v47  ;;  %v821_v58 = vrot.slane %v1765_v44, 1  ;;  %v822_v59 = vrot.slane %v2236_v13, 1  ;;  %v1691_v13 = vld [vmem:[%s2159_s24 + $0x24] sm:$0xf]  ;;  %v259_v37 = vld [vmem:[%s2159_s24 + $0x48] sm:$0xf] }
  0x2e   : > { %643 = vrot.lane.b32.xlu1 %v1750_v12, %s2092_s25  ;;  %v1762_v61 = vcombine.low %v1680_v53, %v2229_v63  ;;  %v696_v62 = vsel %vm415_vm1, %v691_v51, %v695_v52  ;;  %v809_v0 = vrot.slane %v1761_v48, 1  ;;  %v810_v3 = vrot.slane %v2241_v20, 1  ;;  %v2316_v26 = vld [vmem:[%s2159_s24 + $0x20] ss:$0 sps:$4 sm:$0x11]  }
  0x2f   : > { %635 = vrot.lane.b32.xlu0 %v1746_v19, %s2092_s25  ;;  %v1773_v57 = vcombine.low %v1697_v54, %v2278_v1  ;;  %v1769_v6 = vcombine.low %v1689_v55, %v2286_v60  ;;  %v823_v10 = vsel %vm552_vm0, %v821_v58, %v822_v59  ;;  %v824_v63 = vrot.slane %v1766_v56, 1  ;;  %v2322_v34 = vld [vmem:[%s2159_s24 + $0x5c] ss:$0 sps:$4 sm:$0x11]   ;;  %v2331_v39 = vld [vmem:[%s2159_s24 + $0x4c] sm:$0xf] }
  0x30   : > { %v825_v12 = vrot.slane %v2248_v24, 1  ;;  %v811_v15 = vsel %vm552_vm0, %v809_v0, %v810_v3  ;;  %v812_v16 = vrot.slane %v1762_v61, 1  ;;  %v813_v19 = vrot.slane %v2259_v11, 1  ;;  %v2327_v36 = vld [vmem:[%s2159_s24 + $0x2c] ss:$0 sps:$4 sm:$0x11]  }
  0x31   : > { %v980_v20 = vshll.u32 %v1773_v57, 16  ;;  %v1774_v8 = vcombine.low %v1699_v7, %v2296_v9  ;;  %v932_v22 = vshll.u32 %v1769_v6, 16  ;;  %v1770_v24 = vcombine.low %v1691_v13, %v2303_v14  ;;  %v251_v40 = vld [vmem:[%s2159_s24 + $0x18] sm:$0xf]  ;;  %v2335_v17 = vld [vmem:[%s2159_s24 + $0x1c] sm:$0xf] }
  0x32   : > { %777 = vrot.lane.b32.xlu1 %v732_v45, %s2095_s28  ;;  %v826_v25 = vsel %vm552_vm0, %v824_v63, %v825_v12  ;;  %v814_v27 = vsel %vm552_vm0, %v812_v16, %v813_v19  ;;  %v978_v29 = vshrl.u32 %v1773_v57, 16  ;;  %v985_v32 = vshll.u32 %v2309_v21, 16  ;;  %v2049_v41 = vld [vmem:[%s2707_s1] sm:$0xff]   ;;  %v1717_v42 = vld [vmem:[%s2159_s24 + $0x48] sm:$0xe] }
  0x33   : > { %769 = vrot.lane.b32.xlu0 %v684_v50, %s2095_s28  ;;  %v992_v28 = vshll.u32 %v1774_v8, 16  ;;  %v982_v30 = vrot.slane %v980_v20, 1  ;;  %v944_v2 = vshll.u32 %v1770_v24, 16  ;;  %v930_v11 = vshrl.u32 %v1769_v6, 16  ;;  %v1713_v47 = vld [vmem:[%s2159_s24 + $0x18] sm:$0xe]  ;;  %1898 = vmatprep.subr.bf16.mxu0 %v2049_v41 }
  0x34   : > { %v934_v33 = vrot.slane %v932_v22, 1  ;;  %v937_v35 = vshll.u32 %v2316_v26, 16  ;;  %v987_v43 = vrot.slane %v985_v32, 1  ;;  %v990_v44 = vshrl.u32 %v1774_v8, 16  ;;  %1920 = vmatprep.subr.bf16.mxu1 %v2049_v41  ;;  %1899 = vmatpush3.bf16.msra.mxu0 %v2049_v41  ;;  %v2050_v56 = vld [vmem:[%s2707_s1 + $0x8] sm:$0xff]  }
  0x35   : > { %v983_v5 = vor.u32 %v982_v30, %v978_v29  ;;  %v994_v45 = vrot.slane %v992_v28, 1  ;;  %v997_v46 = vshll.u32 %v2322_v34, 16  ;;  %v942_v48 = vshrl.u32 %v1770_v24, 16  ;;  %1923 = vmatpush3.bf16.msra.mxu1 %v2049_v41  ;;  %v2359_v61 = vld [vmem:[%s2159_s24 + $0x50] ss:$0 sps:$4 sm:$0x11]   ;;  %1900 = vmatprep.subr.bf16.mxu0 %v2050_v56 }
  0x36   : > { %779 = vrot.lane.b32.xlu1 %v744_v4, %s2095_s28  ;;  %v946_v49 = vrot.slane %v944_v2, 1  ;;  %v949_v50 = vshll.u32 %v2327_v36, 16  ;;  %v2347_v51 = vcombine.low %v259_v37, %v2331_v39  ;;  %v935_v52 = vor.u32 %v934_v33, %v930_v11  ;;  %v261_v7 = vld [vmem:[%s2159_s24 + $0x54] sm:$0xf]  ;;  %1921 = vmatprep.subr.bf16.mxu1 %v2050_v56  ;;  %v253_v13 = vld [vmem:[%s2159_s24 + $0x24] sm:$0xf] }
  0x37   : > { %771 = vrot.lane.b32.xlu0 %v696_v62, %s2095_s28  ;;  %v939_v53 = vrot.slane %v937_v35, 1  ;;  %v2350_v54 = vcombine.low %v251_v40, %v2335_v17  ;;  %v1789_v55 = vcombine.low %v1717_v42, %v2278_v1  ;;  %v1785_v4 = vcombine.low %v1713_v47, %v2286_v60  ;;  %v1718_v16 = vld [vmem:[%s2159_s24 + $0x54] sm:$0xe]  ;;  %v2401_v40 = vld [vmem:[%s2159_s24 + $0x5c] ss:$0 sps:$4 sm:$0x11]  }
  0x38   : > { %v995_v58 = vor.u32 %v994_v45, %v990_v44  ;;  %v999_v59 = vrot.slane %v997_v46, 1  ;;  %v988_v1 = vsel %vm415_vm1, %v983_v5, %v987_v43  ;;  %v947_v62 = vor.u32 %v946_v49, %v942_v48  ;;  %1901 = vmatpush3.bf16.msra.mxu0 %v2050_v56 }
  0x39   : > { %v951_v0 = vrot.slane %v949_v50, 1  ;;  %v491_v3 = vshll.u32 %v2347_v51, 16  ;;  %v940_v60 = vsel %vm415_vm1, %v935_v52, %v939_v53  ;;  %v1077_v63 = vrot.slane %v1789_v55, 1  ;;  %1924 = vmatpush3.bf16.msra.mxu1 %v2050_v56  ;;  %v277_v53 = vld [vmem:[%s2159_s24 + $0x48] sm:$0xe] }
  0x3a   : > { %841 = vrot.lane.b32.xlu1 %v823_v10, %s2096_s29  ;;  %v2371_v10 = vld [vmem:[%s2159_s24 + $0x58] sm:$0xf]  ;;  %v1078_v12 = vrot.slane %v2309_v21, 1  ;;  %v1000_v19 = vsel %vm415_vm1, %v995_v58, %v999_v59  ;;  %v1065_v20 = vrot.slane %v1785_v4, 1  ;;  %v496_v22 = vshll.u32 %v2359_v61, 16 }
  0x3b   : > { %833 = vrot.lane.b32.xlu0 %v811_v15, %s2096_s29  ;;  %v2376_v15 = vld [vmem:[%s2159_s24 + $0x28] sm:$0xf]  ;;  %v952_v21 = vsel %vm415_vm1, %v947_v62, %v951_v0  ;;  %v2388_v28 = vcombine.low %v261_v7, %v2371_v10  ;;  %v441_v29 = vshrl.u32 %v2350_v54, 16  ;;  %v1790_v2 = vcombine.low %v1718_v16, %v2296_v9  ;;  %v2406_v9 = vld [vmem:[%s2159_s24 + $0x2c] ss:$0 sps:$4 sm:$0x11]  }
  0x3c   : > { %v2393_v32 = vcombine.low %v253_v13, %v2376_v15  ;;  %v498_v33 = vrot.slane %v496_v22, 1  ;;  %v1079_v35 = vsel %vm552_vm0, %v1077_v63, %v1078_v12  ;;  %v1081_v45 = vrot.slane %v2322_v34, 1  ;;  %v278_v7 = vld [vmem:[%s2159_s24 + $0x54] sm:$0xe]  ;;  %v274_v63 = vld [vmem:[%s2159_s24 + $0x24] sm:$0xe] }
  0x3d   : > { %v503_v5 = vshll.u32 %v2388_v28, 16  ;;  %v1080_v44 = vrot.slane %v1790_v2, 1  ;;  %v1069_v47 = vrot.slane %v2327_v36, 1  ;;  %v501_v49 = vshrl.u32 %v2388_v28, 16  ;;  %v273_v36 = vld [vmem:[%s2159_s24 + $0x18] sm:$0xe] }
  0x3e   : > { %843 = vrot.lane.b32.xlu1 %v826_v25, %s2096_s29  ;;  %v489_v25 = vshrl.u32 %v2347_v51, 16  ;;  %v508_v52 = vshll.u32 %v2401_v40, 16  ;;  %v453_v56 = vshrl.u32 %v2393_v32, 16  ;;  %v460_v4 = vshll.u32 %v2406_v9, 16 }
  0x3f   : > { %835 = vrot.lane.b32.xlu0 %v814_v27, %s2096_s29  ;;  %v493_v27 = vrot.slane %v491_v3, 1  ;;  %v505_v50 = vrot.slane %v503_v5, 1  ;;  %v1082_v58 = vsel %vm552_vm0, %v1080_v44, %v1081_v45  ;;  %v1743_v62 = vcombine.low %v277_v53, %v2331_v39  ;;  %v2051_v5 = vld [vmem:[%s2707_s1 + $0x10] ss:$0 sps:$4 sm:$0x33]  }
  0x40   : > { %v1739_v0 = vcombine.low %v273_v36, %v2335_v17  ;;  %v572_v12 = vrot.slane %v2359_v61, 1  ;;  %v1740_v61 = vcombine.low %v274_v63, %v2376_v15  ;;  %v2453_v15 = vld [vmem:[%s2159_s24 + $0x64] sm:$0xf]  ;;  %v2474_v44 = vld [vmem:[%s2159_s24 + $0x2c] ss:$0 sps:$4 sm:$0x11]   ;;  %1926 = vmatprep.subr.msk.bf16.mxu0 %vm1285_vm2, %v2051_v5  ;;  %1927 = vmatprep.subr.msk.bf16.mxu1 %vm1285_vm2, %v2051_v5 }
  0x41   : > { %v494_v37 = vor.u32 %v493_v27, %v489_v25  ;;  %v506_v59 = vor.u32 %v505_v50, %v501_v49  ;;  %v571_v16 = vrot.slane %v1743_v62, 1  ;;  %v575_v27 = vrot.slane %v2401_v40, 1  ;;  %v2480_v53 = vld [vmem:[%s2159_s24 + $0x68] ss:$0 sps:$4 sm:$0x11]  }
  0x42   : > { %897 = vrot.lane.b32.xlu1 %v1773_v57, %s2097_s5  ;;  %v2365_v57 = vld [vmem:[%s2159_s24 + $0x20] ss:$0 sps:$4 sm:$0x11]   ;;  %v559_v17 = vrot.slane %v1739_v0, 1  ;;  %v562_v2 = vrot.slane %v1740_v61, 1  ;;  %v765_v62 = vshll.u32 %v2480_v53, 16 }
  0x43   : > { %889 = vrot.lane.b32.xlu0 %v1769_v6, %s2097_s5  ;;  %v443_v6 = vshll.u32 %v2350_v54, 16  ;;  %v499_v48 = vsel %vm415_vm1, %v494_v37, %v498_v33  ;;  %v560_v13 = vrot.slane %v2365_v57, 1  ;;  %v1661_v33 = vld [vmem:[%s2159_s24 + $0x30] sm:$0xf]  ;;  %v1685_v0 = vld [vmem:[%s2159_s24 + $0x54] sm:$0xe] }
  0x44   : > { %v1681_v63 = vld [vmem:[%s2159_s24 + $0x24] sm:$0xe] }
  0x45   : > { %v445_v30 = vrot.slane %v443_v6, 1  ;;  %v462_v6 = vrot.slane %v460_v4, 1 }
  0x46   : > { %899 = vrot.lane.b32.xlu1 %v1774_v8, %s2097_s5  ;;  %v1066_v8 = vrot.slane %v2316_v26, 1  ;;  %v448_v26 = vshll.u32 %v2365_v57, 16  ;;  %v1659_v57 = vld [vmem:[%s2159_s24 + $0x24] sm:$0xf] }
  0x47   : > { %891 = vrot.lane.b32.xlu0 %v1770_v24, %s2097_s5  ;;  %v1714_v24 = vld [vmem:[%s2159_s24 + $0x24] sm:$0xe]  ;;  %v446_v42 = vor.u32 %v445_v30, %v441_v29  ;;  %v1669_v30 = vld [vmem:[%s2159_s24 + $0x60] sm:$0xf] }
  0x48   : > { %v1786_v11 = vcombine.low %v1714_v24, %v2303_v14  ;;  %v1067_v41 = vsel %vm552_vm0, %v1065_v20, %v1066_v8  ;;  %v450_v43 = vrot.slane %v448_v26, 1  ;;  %v455_v14 = vshll.u32 %v2393_v32, 16  ;;  %v1667_v20 = vld [vmem:[%s2159_s24 + $0x54] sm:$0xf]  ;;  %v2437_v8 = vld [vmem:[%s2159_s24 + $0x58] sm:$0xf] }
  0x49   : > { %v2443_v24 = vld [vmem:[%s2159_s24 + $0x28] sm:$0xf]  ;;  %v561_v26 = vsel %vm552_vm0, %v559_v17, %v560_v13  ;;  %v1752_v40 = vcombine.low %v1669_v30, %v2453_v15 }
  0x4a   : > { %1033 = vrot.lane.b32.xlu1 %v988_v1, %s2098_s8  ;;  %v1068_v46 = vrot.slane %v1786_v11, 1  ;;  %v451_v55 = vsel %vm415_vm1, %v446_v42, %v450_v43  ;;  %v457_v34 = vrot.slane %v455_v14, 1  ;;  %v510_v1 = vrot.slane %v508_v52, 1  ;;  %v2469_v43 = vld [vmem:[%s2159_s24 + $0x5c] ss:$0 sps:$4 sm:$0x11]  }
  0x4b   : > { %1025 = vrot.lane.b32.xlu0 %v940_v60, %s2098_s8  ;;  %v1747_v29 = vcombine.low %v1659_v57, %v2443_v24  ;;  %v563_v11 = vrot.slane %v2406_v9, 1  ;;  %v760_v45 = vshll.u32 %v1752_v40, 16  ;;  %v753_v49 = vshll.u32 %v2469_v43, 16  ;;  %v1682_v57 = vld [vmem:[%s2159_s24 + $0x30] sm:$0xe] }
  0x4c   : > { %v1070_v3 = vsel %vm552_vm0, %v1068_v46, %v1069_v47  ;;  %v458_v60 = vor.u32 %v457_v34, %v453_v56  ;;  %v511_v39 = vsel %vm415_vm1, %v506_v59, %v510_v1  ;;  %v705_v56 = vshll.u32 %v2474_v44, 16  ;;  %v2484_v34 = vld [vmem:[%s2159_s24 + $0x38] ss:$0 sps:$4 sm:$0x11]  }
  0x4d   : > { %v700_v42 = vshll.u32 %v1747_v29, 16  ;;  %v564_v9 = vsel %vm552_vm0, %v562_v2, %v563_v11  ;;  %v698_v50 = vshrl.u32 %v1747_v29, 16  ;;  %v758_v36 = vshrl.u32 %v1752_v40, 16  ;;  %v1693_v2 = vld [vmem:[%s2159_s24 + $0x30] sm:$0xf] }
  0x4e   : > { %1035 = vrot.lane.b32.xlu1 %v1000_v19, %s2098_s8  ;;  %v1744_v19 = vcombine.low %v278_v7, %v2371_v10  ;;  %v463_v22 = vsel %vm415_vm1, %v458_v60, %v462_v6  ;;  %v573_v10 = vsel %vm552_vm0, %v571_v16, %v572_v12  ;;  %v762_v1 = vrot.slane %v760_v45, 1  ;;  %v2514_v11 = vld [vmem:[%s2159_s24 + $0x34] sm:$0xf]  ;;  %v2530_v45 = vld [vmem:[%s2159_s24 + $0x40] sm:$0xf] }
  0x4f   : > { %1027 = vrot.lane.b32.xlu0 %v952_v21, %s2098_s8  ;;  %v1751_v21 = vcombine.low %v1667_v20, %v2437_v8  ;;  %v702_v52 = vrot.slane %v700_v42, 1  ;;  %v717_v7 = vshll.u32 %v2484_v34, 16  ;;  %v1767_v12 = vcombine.low %v1685_v0, %v2437_v8  ;;  %v2524_v42 = vld [vmem:[%s2159_s24 + $0x70] sm:$0xf] }
  0x50   : > { %v574_v25 = vrot.slane %v1744_v19, 1  ;;  %v767_v16 = vrot.slane %v765_v62, 1  ;;  %v1763_v17 = vcombine.low %v1681_v63, %v2443_v24  ;;  %v1686_v19 = vld [vmem:[%s2159_s24 + $0x60] sm:$0xe] }
  0x51   : > { %v748_v37 = vshll.u32 %v1751_v21, 16  ;;  %v746_v46 = vshrl.u32 %v1751_v21, 16  ;;  %v703_v59 = vor.u32 %v702_v52, %v698_v50  ;;  %v719_v61 = vrot.slane %v717_v7, 1  ;;  %v1701_v24 = vld [vmem:[%s2159_s24 + $0x60] sm:$0xf] }
  0x52   : > { %1097 = vrot.lane.b32.xlu1 %v1079_v35, %s2099_s9  ;;  %v2459_v35 = vld [vmem:[%s2159_s24 + $0x34] sm:$0xf]  ;;  %v1768_v8 = vcombine.low %v1686_v19, %v2453_v15  ;;  %v816_v15 = vrot.slane %v2474_v44, 1  ;;  %v1695_v44 = vld [vmem:[%s2159_s24 + $0x3c] sm:$0xf] }
  0x53   : > { %1089 = vrot.lane.b32.xlu0 %v1067_v41, %s2099_s9  ;;  %v576_v41 = vsel %vm552_vm0, %v574_v25, %v575_v27  ;;  %v1748_v14 = vcombine.low %v1661_v33, %v2459_v35  ;;  %v750_v47 = vrot.slane %v748_v37, 1  ;;  %v828_v25 = vrot.slane %v2469_v43, 1  ;;  %v2507_v27 = vld [vmem:[%s2159_s24 + $0x64] sm:$0xf] }
  0x54   : > { %v1775_v33 = vcombine.low %v1701_v24, %v2507_v27  ;;  %v2045_v50 = vld [vmem:[%s2159_s24 + $0x68] ss:$0 sps:$4 sm:$0x11]  }
  0x55   : > { %v751_v4 = vor.u32 %v750_v47, %v746_v46  ;;  %v710_v60 = vshrl.u32 %v1748_v14, 16 }
  0x56   : > { %524 = vrot.lane.b32.xlu1 %v499_v48, %s2094_s27  ;;  %v1287_v48 = vsel %vm1285_vm2, %v2051_v5, 0  ;;  %v1771_v5 = vcombine.low %v1693_v2, %v2514_v11  ;;  %v1004_v46 = vshll.u32 %v1775_v33, 16 }
  0x57   : > { %516 = vrot.lane.b32.xlu0 %v451_v55, %s2094_s27  ;;  %v712_v55 = vshll.u32 %v1748_v14, 16  ;;  %1903 = vmatpush3.bf16.msra.mxu0 %v1287_v48 }
  0x58   : > { %1925 = vmatpush3.bf16.msra.mxu1 %v1287_v48 }
  0x59   : > { %v714_v6 = vrot.slane %v712_v55, 1  ;;  %v2046_v55 = vld [vmem:[%s2159_s24 + $0x38] ss:$0 sps:$4 sm:$0x11]  }
  0x5a   : > { %1099 = vrot.lane.b32.xlu1 %v1082_v58, %s2099_s9  ;;  %v755_v58 = vrot.slane %v753_v49, 1  ;;  %v956_v49 = vshll.u32 %v1771_v5, 16  ;;  %v961_v0 = vshll.u32 %v2046_v55, 16 }
  0x5b   : > { %1091 = vrot.lane.b32.xlu0 %v1070_v3, %s2099_s9  ;;  %v707_v3 = vrot.slane %v705_v56, 1 }
  0x5c   : > { %v756_v13 = vsel %vm415_vm1, %v751_v4, %v755_v58  ;;  %v1006_v4 = vrot.slane %v1004_v46, 1  ;;  %v954_v58 = vshrl.u32 %v1771_v5, 16 }
  0x5d   : > { %v708_v20 = vsel %vm415_vm1, %v703_v59, %v707_v3  ;;  %v958_v59 = vrot.slane %v956_v49, 1  ;;  %v2048_v3 = vld [vmem:[%s2159_s24 + $0x44] ss:$0 sps:$4 sm:$0x11]  }
  0x5e   : > { %526 = vrot.lane.b32.xlu1 %v511_v39, %s2094_s27  ;;  %v763_v39 = vor.u32 %v762_v1, %v758_v36  ;;  %v1009_v36 = vshll.u32 %v2045_v50, 16  ;;  %v2047_v1 = vld [vmem:[%s2159_s24 + $0x74] ss:$0 sps:$4 sm:$0x11]  }
  0x5f   : > { %518 = vrot.lane.b32.xlu0 %v463_v22, %s2094_s27  ;;  %v715_v22 = vor.u32 %v714_v6, %v710_v60  ;;  %v959_v63 = vor.u32 %v958_v59, %v954_v58 }
  0x60   : > { %v1011_v7 = vrot.slane %v1009_v36, 1 }
  0x61   : > { %v720_v30 = vsel %vm415_vm1, %v715_v22, %v719_v61  ;;  %v1715_v22 = vld [vmem:[%s2159_s24 + $0x30] sm:$0xe] }
  0x62   : > { %589 = vrot.lane.b32.xlu1 %v573_v10, %s2093_s26  ;;  %v827_v10 = vrot.slane %v1767_v12, 1 }
  0x63   : > { %581 = vrot.lane.b32.xlu0 %v561_v26, %s2093_s26  ;;  %v815_v26 = vrot.slane %v1763_v17, 1 }
  0x64   : > { %v829_v37 = vsel %vm552_vm0, %v827_v10, %v828_v25  ;;  %v1787_v10 = vcombine.low %v1715_v22, %v2514_v11  ;;  %v1720_v25 = vld [vmem:[%s2159_s24 + $0x6c] sm:$0xe] }
  0x65   : > { %v817_v43 = vsel %vm552_vm0, %v815_v26, %v816_v15  ;;  %v1716_v15 = vld [vmem:[%s2159_s24 + $0x3c] sm:$0xe] }
  0x66   : > { %591 = vrot.lane.b32.xlu1 %v576_v41, %s2093_s26  ;;  %v1703_v41 = vld [vmem:[%s2159_s24 + $0x6c] sm:$0xf]  ;;  %v1788_v11 = vcombine.low %v1716_v15, %v2530_v45 }
  0x67   : > { %583 = vrot.lane.b32.xlu0 %v564_v9, %s2093_s26  ;;  %v1776_v47 = vcombine.low %v1703_v41, %v2524_v42  ;;  %v1072_v41 = vrot.slane %v2046_v55, 1  ;;  %s2673_s26 = scalar_lea.vmem %s2709_s3, %s1649_s13 }
  0x69   : > { %v1016_v56 = vshll.u32 %v1776_v47, 16  ;;  %v1014_v6 = vshrl.u32 %v1776_v47, 16 }
  0x6a   : > { %645 = vrot.lane.b32.xlu1 %v1751_v21, %s2092_s25  ;;  %v768_v21 = vsel %vm415_vm1, %v763_v39, %v767_v16  ;;  %v1719_v39 = vld [vmem:[%s2159_s24 + $0x60] sm:$0xe]  ;;  %v963_v16 = vrot.slane %v961_v0, 1 }
  0x6b   : > { %637 = vrot.lane.b32.xlu0 %v1747_v29, %s2092_s25  ;;  %v1764_v29 = vcombine.low %v1682_v57, %v2459_v35  ;;  %v831_v35 = vrot.slane %v2480_v53, 1  ;;  %v1772_v53 = vcombine.low %v1695_v44, %v2530_v45  ;;  %v1018_v12 = vrot.slane %v1016_v56, 1 }
  0x6c   : > { %v1791_v61 = vcombine.low %v1719_v39, %v2507_v27  ;;  %v964_v24 = vsel %vm415_vm1, %v959_v63, %v963_v16  ;;  %v1792_v27 = vcombine.low %v1720_v25, %v2524_v42 }
  0x6d   : > { %v818_v9 = vrot.slane %v1764_v29, 1  ;;  %v968_v62 = vshll.u32 %v1772_v53, 16  ;;  %v966_v17 = vshrl.u32 %v1772_v53, 16 }
  0x6e   : > { %647 = vrot.lane.b32.xlu1 %v1752_v40, %s2092_s25  ;;  %v830_v40 = vrot.slane %v1768_v8, 1  ;;  %v1019_v8 = vor.u32 %v1018_v12, %v1014_v6  ;;  %v1086_v42 = vrot.slane %v1792_v27, 1 }
  0x6f   : > { %639 = vrot.lane.b32.xlu0 %v1748_v14, %s2092_s25  ;;  %v819_v14 = vrot.slane %v2484_v34, 1  ;;  %v1002_v34 = vshrl.u32 %v1775_v33, 16  ;;  %v970_v19 = vrot.slane %v968_v62, 1 }
  0x70   : > { %v832_v48 = vsel %vm552_vm0, %v830_v40, %v831_v35  ;;  %v1084_v40 = vrot.slane %v2045_v50, 1 }
  0x71   : > { %v820_v52 = vsel %vm552_vm0, %v818_v9, %v819_v14  ;;  %v1007_v60 = vor.u32 %v1006_v4, %v1002_v34  ;;  %v1087_v14 = vrot.slane %v2047_v1, 1 }
  0x72   : > { %781 = vrot.lane.b32.xlu1 %v756_v13, %s2095_s28  ;;  %v1021_v13 = vshll.u32 %v2047_v1, 16 }
  0x73   : > { %773 = vrot.lane.b32.xlu0 %v708_v20, %s2095_s28  ;;  %v973_v20 = vshll.u32 %v2048_v3, 16  ;;  %v1012_v57 = vsel %vm415_vm1, %v1007_v60, %v1011_v7  ;;  %v1088_v49 = vsel %vm552_vm0, %v1086_v42, %v1087_v14 }
  0x75   : > { %v975_v26 = vrot.slane %v973_v20, 1 }
  0x76   : > { %783 = vrot.lane.b32.xlu1 %v768_v21, %s2095_s28  ;;  %v1023_v21 = vrot.slane %v1021_v13, 1 }
  0x77   : > { %775 = vrot.lane.b32.xlu0 %v720_v30, %s2095_s28  ;;  %v971_v30 = vor.u32 %v970_v19, %v966_v17 }
  0x79   : > { %v976_v35 = vsel %vm415_vm1, %v971_v30, %v975_v26 }
  0x7a   : > { %845 = vrot.lane.b32.xlu1 %v829_v37, %s2096_s29  ;;  %v1083_v37 = vrot.slane %v1791_v61, 1 }
  0x7b   : > { %837 = vrot.lane.b32.xlu0 %v817_v43, %s2096_s29 }
  0x7c   : > { %v1085_v9 = vsel %vm552_vm0, %v1083_v37, %v1084_v40 }
  0x7e   : > { %847 = vrot.lane.b32.xlu1 %v832_v48, %s2096_s29  ;;  %v1075_v48 = vrot.slane %v2048_v3, 1 }
  0x7f   : > { %839 = vrot.lane.b32.xlu0 %v820_v52, %s2096_s29 }
  0x82   : > { %901 = vrot.lane.b32.xlu1 %v1775_v33, %s2097_s5  ;;  %v1024_v33 = vsel %vm415_vm1, %v1019_v8, %v1023_v21 }
  0x83   : > { %893 = vrot.lane.b32.xlu0 %v1771_v5, %s2097_s5  ;;  %v1071_v5 = vrot.slane %v1787_v10, 1 }
  0x85   : > { %v1073_v46 = vsel %vm552_vm0, %v1071_v5, %v1072_v41 }
  0x86   : > { %903 = vrot.lane.b32.xlu1 %v1776_v47, %s2097_s5  ;;  %v1074_v47 = vrot.slane %v1788_v11, 1 }
  0x87   : > { %895 = vrot.lane.b32.xlu0 %v1772_v53, %s2097_s5 }
  0x88   : > { %v1076_v50 = vsel %vm552_vm0, %v1074_v47, %v1075_v48 }
  0x8a   : > { %v2555_v29 = vpop.permute.xlu1 %641  ;;  %1037 = vrot.lane.b32.xlu1 %v1012_v57, %s2098_s8 }
  0x8b   : > { %v634_v2 = vpop.permute.xlu0 %633  ;;  %1029 = vrot.lane.b32.xlu0 %v964_v24, %s2098_s8 }
  0x8e   : > { %1039 = vrot.lane.b32.xlu1 %v1024_v33, %s2098_s8 }
  0x8f   : > { %v586_v43 = vpop.permute.xlu1 %585  ;;  %1031 = vrot.lane.b32.xlu0 %v976_v35, %s2098_s8 }
  0x90   : > { %v578_v44 = vpop.permute.xlu0 %577 }
  0x92   : > { %1101 = vrot.lane.b32.xlu1 %v1085_v9, %s2099_s9 }
  0x93   : > { %v588_v45 = vpop.permute.xlu1 %587  ;;  %1093 = vrot.lane.b32.xlu0 %v1073_v46, %s2099_s9 }
  0x95   : > { %v580_v52 = vpop.permute.xlu0 %579 }
  0x96   : > { %1103 = vrot.lane.b32.xlu1 %v1088_v49, %s2099_s9 }
  0x97   : > { %1095 = vrot.lane.b32.xlu0 %v1076_v50, %s2099_s9 }
  0x98   : > { %v515_v53 = vpop.permute.xlu1 %514 }
  0x99   : > { %v513_v55 = vpop.permute.xlu0 %512 }
  0x9a   : > { %v1107_v16 = vsel %vm1105_vm3, %v2196_v23, %v513_v55 }
  0x9b   : > { %v1124_v22 = vsel %vm1122_vm4, %v1107_v16, %v578_v44 }
  0x9c   : > { %v523_v56 = vpop.permute.xlu1 %522  ;;  %v1141_v8 = vsel %vm1139_vm5, %v1124_v22, %v634_v2  ;;  %v1109_v2 = vsel %vm1105_vm3, %v2209_v38, %v515_v53 }
  0x9d   : > { %v521_v34 = vpop.permute.xlu0 %520  ;;  %v1126_v35 = vsel %vm1122_vm4, %v1109_v2, %v580_v52 }
  0x9e   : > { %v1115_v39 = vsel %vm1105_vm3, %v2191_v18, %v521_v34 }
  0x9f   : > { %v1132_v19 = vsel %vm1122_vm4, %v1115_v39, %v586_v43 }
  0xa0   : > { %v644_v4 = vpop.permute.xlu1 %643  ;;  %v1149_v61 = vsel %vm1139_vm5, %v1132_v19, %v2555_v29  ;;  %v1117_v29 = vsel %vm1105_vm3, %v2203_v31, %v523_v56 }
  0xa1   : > { %v636_v36 = vpop.permute.xlu0 %635  ;;  %v1134_v11 = vsel %vm1122_vm4, %v1117_v29, %v588_v45 }
  0xa2   : > { %v1151_v31 = vsel %vm1139_vm5, %v1134_v11, %v644_v4  ;;  %v1143_v38 = vsel %vm1139_vm5, %v1126_v35, %v636_v36 }
  0xa4   : > { %v778_v58 = vpop.permute.xlu1 %777 }
  0xa5   : > { %v770_v59 = vpop.permute.xlu0 %769  ;;  %v1166_v18 = vsel %vm1156_vm6, %v1149_v61, %v778_v58 }
  0xa6   : > { %v1158_v21 = vsel %vm1156_vm6, %v1141_v8, %v770_v59 }
  0xa8   : > { %v780_v1 = vpop.permute.xlu1 %779 }
  0xa9   : > { %v772_v62 = vpop.permute.xlu0 %771  ;;  %v1168_v41 = vsel %vm1156_vm6, %v1151_v31, %v780_v1 }
  0xaa   : > { %v1160_v9 = vsel %vm1156_vm6, %v1143_v38, %v772_v62 }
  0xac   : > { %v842_v0 = vpop.permute.xlu1 %841 }
  0xad   : > { %v834_v3 = vpop.permute.xlu0 %833  ;;  %v1183_v10 = vsel %vm1173_vm7, %v1166_v18, %v842_v0 }
  0xae   : > { %v1175_v25 = vsel %vm1173_vm7, %v1158_v21, %v834_v3 }
  0xb0   : > { %v844_v60 = vpop.permute.xlu1 %843 }
  0xb1   : > { %v836_v6 = vpop.permute.xlu0 %835  ;;  %v1185_v42 = vsel %vm1173_vm7, %v1168_v41, %v844_v60 }
  0xb2   : > { %v1177_v14 = vsel %vm1173_vm7, %v1160_v9, %v836_v6 }
  0xb4   : > { %v898_v7 = vpop.permute.xlu1 %897 }
  0xb5   : > { %v890_v63 = vpop.permute.xlu0 %889  ;;  %v1200_v24 = vsel %vm1190_vm8, %v1183_v10, %v898_v7 }
  0xb6   : > { %v1192_v30 = vsel %vm1190_vm8, %v1175_v25, %v890_v63 }
  0xb8   : > { %v900_v12 = vpop.permute.xlu1 %899 }
  0xb9   : > { %v892_v13 = vpop.permute.xlu0 %891  ;;  %v1202_v44 = vsel %vm1190_vm8, %v1185_v42, %v900_v12 }
  0xba   : > { %v1194_v46 = vsel %vm1190_vm8, %v1177_v14, %v892_v13 }
  0xbc   : > { %v1034_v17 = vpop.permute.xlu1 %1033 }
  0xbd   : > { %v1026_v20 = vpop.permute.xlu0 %1025  ;;  %v1217_v26 = vsel %vm1207_vm9, %v1200_v24, %v1034_v17 }
  0xbe   : > { %v1209_v27 = vsel %vm1207_vm9, %v1192_v30, %v1026_v20 }
  0xc0   : > { %v1036_v57 = vpop.permute.xlu1 %1035 }
  0xc1   : > { %v1028_v23 = vpop.permute.xlu0 %1027  ;;  %v1219_v47 = vsel %vm1207_vm9, %v1202_v44, %v1036_v57 }
  0xc2   : > { %v1211_v45 = vsel %vm1207_vm9, %v1194_v46, %v1028_v23 }
  0xc4   : > { %v1098_v15 = vpop.permute.xlu1 %1097 }
  0xc5   : > { %v1090_v33 = vpop.permute.xlu0 %1089  ;;  %v1234_v37 = vsel %vm1224_vm10, %v1217_v26, %v1098_v15 }
  0xc6   : > { %v1226_v40 = vsel %vm1224_vm10, %v1209_v27, %v1090_v33  ;;  %1912 = vmatprep.mubr.msk.bf16.mxu1 %vm1268_vm11, %v1234_v37 }
  0xc7   : > { %1904 = vmatprep.mubr.msk.bf16.mxu0 %vm1268_vm11, %v1226_v40 }
  0xc8   : > { %v525_v5 = vpop.permute.xlu1 %524 }
  0xc9   : > { %v517_v43 = vpop.permute.xlu0 %516  ;;  %v1119_v56 = vsel %vm1105_vm3, %v2347_v51, %v525_v5 }
  0xca   : > { %v1111_v4 = vsel %vm1105_vm3, %v2350_v54, %v517_v43 }
  0xcc   : > { %v1100_v48 = vpop.permute.xlu1 %1099 }
  0xcd   : > { %v1236_v49 = vsel %vm1224_vm10, %v1219_v47, %v1100_v48  ;;  %v1092_v50 = vpop.permute.xlu0 %1091 }
  0xce   : > { %v1228_v52 = vsel %vm1224_vm10, %v1211_v45, %v1092_v50  ;;  %1913 = vmatmul.mubr.msk.bf16.vlgmr.msra.gmra.mrb[0].mxu1 %vm1268_vm11, %v1236_v49  ;;  %v2659_v50 = vld [vmem:[%s2708_s2] ss:$0 sm:$0xff] }
  0xcf   : > { %1905 = vmatmul.mubr.msk.bf16.vlgmr.msra.gmra.mrb[0].mxu0 %vm1268_vm11, %v1228_v52 }
  0xd0   : > { %v527_v53 = vpop.permute.xlu1 %526 }
  0xd1   : > { %v519_v55 = vpop.permute.xlu0 %518  ;;  %v1121_v1 = vsel %vm1105_vm3, %v2388_v28, %v527_v53 }
  0xd2   : > { %v1113_v0 = vsel %vm1105_vm3, %v2393_v32, %v519_v55 }
  0xd4   : > { %v590_v34 = vpop.permute.xlu1 %589 }
  0xd5   : > { %v1136_v36 = vsel %vm1122_vm4, %v1119_v56, %v590_v34  ;;  %v582_v58 = vpop.permute.xlu0 %581 }
  0xd6   : > { %v1128_v59 = vsel %vm1122_vm4, %v1111_v4, %v582_v58 }
  0xd8   : > { %v592_v62 = vpop.permute.xlu1 %591 }
  0xd9   : > { %v1138_v3 = vsel %vm1122_vm4, %v1121_v1, %v592_v62  ;;  %v584_v60 = vpop.permute.xlu0 %583 }
  0xda   : > { %v1130_v51 = vsel %vm1122_vm4, %v1113_v0, %v584_v60 }
  0xdc   : > { %v646_v6 = vpop.permute.xlu1 %645 }
  0xdd   : > { %v638_v7 = vpop.permute.xlu0 %637  ;;  %v1153_v23 = vsel %vm1139_vm5, %v1136_v36, %v646_v6 }
  0xde   : > { %v1145_v10 = vsel %vm1139_vm5, %v1128_v59, %v638_v7 }
  0xe0   : > { %v648_v54 = vpop.permute.xlu1 %647 }
  0xe1   : > { %v640_v63 = vpop.permute.xlu0 %639  ;;  %v1155_v2 = vsel %vm1139_vm5, %v1138_v3, %v648_v54 }
  0xe2   : > { %v1147_v40 = vsel %vm1139_vm5, %v1130_v51, %v640_v63 }
  0xe4   : > { %v782_v12 = vpop.permute.xlu1 %781 }
  0xe5   : > { %v774_v13 = vpop.permute.xlu0 %773  ;;  %v1170_v25 = vsel %vm1156_vm6, %v1153_v23, %v782_v12 }
  0xe6   : > { %v1162_v29 = vsel %vm1156_vm6, %v1145_v10, %v774_v13 }
  0xe8   : > { %v784_v39 = vpop.permute.xlu1 %783 }
  0xe9   : > { %v776_v16 = vpop.permute.xlu0 %775  ;;  %v1172_v11 = vsel %vm1156_vm6, %v1155_v2, %v784_v39 }
  0xea   : > { %v1164_v38 = vsel %vm1156_vm6, %v1147_v40, %v776_v16 }
  0xec   : > { %v846_v17 = vpop.permute.xlu1 %845 }
  0xed   : > { %v838_v19 = vpop.permute.xlu0 %837  ;;  %v1187_v30 = vsel %vm1173_vm7, %v1170_v25, %v846_v17 }
  0xee   : > { %v1179_v26 = vsel %vm1173_vm7, %v1162_v29, %v838_v19 }
  0xf0   : > { %v848_v28 = vpop.permute.xlu1 %847 }
  0xf1   : > { %v840_v20 = vpop.permute.xlu0 %839  ;;  %v1189_v41 = vsel %vm1173_vm7, %v1172_v11, %v848_v28 }
  0xf2   : > { %v1181_v9 = vsel %vm1173_vm7, %v1164_v38, %v840_v20 }
  0xf4   : > { %v902_v22 = vpop.permute.xlu1 %901 }
  0xf5   : > { %v894_v61 = vpop.permute.xlu0 %893  ;;  %v1204_v15 = vsel %vm1190_vm8, %v1187_v30, %v902_v22 }
  0xf6   : > { %v1196_v27 = vsel %vm1190_vm8, %v1179_v26, %v894_v61 }
  0xf8   : > { %v904_v32 = vpop.permute.xlu1 %903 }
  0xf9   : > { %v896_v57 = vpop.permute.xlu0 %895  ;;  %v1206_v42 = vsel %vm1190_vm8, %v1189_v41, %v904_v32 }
  0xfa   : > { %v1198_v14 = vsel %vm1190_vm8, %v1181_v9, %v896_v57 }
  0xfc   : > { %v1038_v18 = vpop.permute.xlu1 %1037 }
  0xfd   : > { %v1030_v8 = vpop.permute.xlu0 %1029  ;;  %v1221_v33 = vsel %vm1207_vm9, %v1204_v15, %v1038_v18 }
  0xfe   : > { %v1213_v31 = vsel %vm1207_vm9, %v1196_v27, %v1030_v8 }
 0x100   : > { %v1040_v21 = vpop.permute.xlu1 %1039 }
 0x101   : > { %v1032_v24 = vpop.permute.xlu0 %1031  ;;  %v1223_v44 = vsel %vm1207_vm9, %v1206_v42, %v1040_v21 }
 0x102   : > { %v1215_v47 = vsel %vm1207_vm9, %v1198_v14, %v1032_v24 }
 0x104   : > { %v1102_v37 = vpop.permute.xlu1 %1101 }
 0x105   : > { %v1238_v35 = vsel %vm1224_vm10, %v1221_v33, %v1102_v37  ;;  %v1094_v5 = vpop.permute.xlu0 %1093 }
 0x106   : > { %v1230_v43 = vsel %vm1224_vm10, %v1213_v31, %v1094_v5  ;;  %1916 = vmatprep.mubr.msk.bf16.mxu1 %vm1268_vm11, %v1238_v35 }
 0x107   : > { %1908 = vmatprep.mubr.msk.bf16.mxu0 %vm1268_vm11, %v1230_v43 }
 0x108   : > { %v1104_v46 = vpop.permute.xlu1 %1103 }
 0x109   : > { %v1240_v48 = vsel %vm1224_vm10, %v1223_v44, %v1104_v46  ;;  %v1096_v45 = vpop.permute.xlu0 %1095 }
 0x10a   : > { %v1232_v49 = vsel %vm1224_vm10, %v1215_v47, %v1096_v45  ;;  %1917 = vmatmul.mubr.msk.bf16.gmra.mrb[4].mxu1 %vm1268_vm11, %v1240_v48 }
 0x10b   : > { %1909 = vmatmul.mubr.msk.bf16.gmra.mrb[4].mxu0 %vm1268_vm11, %v1232_v49 }
 0x1a1   : > { %v1914_v52 = vpop.f32.mrb[0].mxu1 }
 0x1a2   : > { %v1906_v53 = vpop.f32.mrb[0].mxu0  ;;  %v1364_v55 = vadd.f32 %v1914_v52, %v2659_v50  ;;  %v1355_v56 = vpop.f32.mrb[1].mxu1 }
 0x1a3   : > { %v1332_v34 = vadd.f32 %v1906_v53, %v2659_v50  ;;  %v1323_v4 = vpop.f32.mrb[1].mxu0  ;;  %v1356_v36 = vadd.f32 %v2659_v50, %v1355_v56  ;;  %v1915_v58 = vpop.f32.mrb[2].mxu1 }
 0x1a4   : > { %v1396_v59 = vmul.f32 0.2, %v1364_v55  ;;  %v1324_v1 = vadd.f32 %v2659_v50, %v1323_v4  ;;  %v1907_v62 = vpop.f32.mrb[2].mxu0  ;;  %v1367_v0 = vadd.f32 %v1915_v58, %v2659_v50  ;;  %v1358_v3 = vpop.f32.mrb[3].mxu1 }
 0x1a5   : > { %v1388_v60 = vmul.f32 0.2, %v1332_v34  ;;  %v1394_v51 = vmul.f32 0.2, %v1356_v36  ;;  %v1335_v6 = vadd.f32 %v1907_v62, %v2659_v50  ;;  %v1326_v7 = vpop.f32.mrb[3].mxu0  ;;  %v1359_v54 = vadd.f32 %v2659_v50, %v1358_v3 }
 0x1a6   : > { %v1386_v63 = vmul.f32 0.2, %v1324_v1  ;;  %v1397_v12 = vmul.f32 0.2, %v1367_v0  ;;  %v1327_v13 = vadd.f32 %v2659_v50, %v1326_v7  ;;  %v1412_v17 = vmax.f32 %v1364_v55, %v1396_v59 }
 0x1a7   : > { %v1389_v39 = vmul.f32 0.2, %v1335_v6  ;;  %v1395_v16 = vmul.f32 0.2, %v1359_v54  ;;  %v1404_v20 = vmax.f32 %v1332_v34, %v1388_v60  ;;  %v1410_v22 = vmax.f32 %v1356_v36, %v1394_v51 }
 0x1a8   : > { %v1413_v19 = vmax.f32 %v1367_v0, %v1397_v12  ;;  %v1387_v28 = vmul.f32 0.2, %v1327_v13  ;;  %v1402_v57 = vmax.f32 %v1324_v1, %v1386_v63 }
 0x1a9   : > { %v1405_v61 = vmax.f32 %v1335_v6, %v1389_v39  ;;  %v1411_v32 = vmax.f32 %v1359_v54, %v1395_v16 }
 0x1aa   : > { %v1868_v18 = vpack.c.bf16 %v1413_v19, %v1412_v17  ;;  %v1403_v8 = vmax.f32 %v1327_v13, %v1387_v28 }
 0x1ab   : > { %v1848_v23 = vpack.c.bf16 %v1405_v61, %v1404_v20  ;;  %v1863_v21 = vpack.c.bf16 %v1411_v32, %v1410_v22 }
 0x1ac   : > { %1884 = vst [vmem:[%s2673_s26 + $0x28] sm:$0xff] %v1868_v18   ;;  %v1843_v10 = vpack.c.bf16 %v1403_v8, %v1402_v57 }
 0x1ad   : > { %1880 = vst [vmem:[%s2673_s26 + $0x8] sm:$0xff] %v1848_v23   ;;  %1883 = vst [vmem:[%s2673_s26 + $0x20] sm:$0xff] %v1863_v21  }
 0x1ae   : > { %1844 = vst [vmem:[%s2673_s26] sm:$0xff] %v1843_v10  }
 0x1dd   : > { %v1918_v25 = vpop.f32.mrb[4].mxu1 }
 0x1de   : > { %v1910_v24 = vpop.f32.mrb[4].mxu0  ;;  %v1380_v29 = vadd.f32 %v1918_v25, %v2659_v50  ;;  %v1371_v30 = vpop.f32.mrb[5].mxu1 }
 0x1df   : > { %v1348_v26 = vadd.f32 %v1910_v24, %v2659_v50  ;;  %v1339_v15 = vpop.f32.mrb[5].mxu0  ;;  %v1372_v2 = vadd.f32 %v2659_v50, %v1371_v30  ;;  %v1919_v27 = vpop.f32.mrb[6].mxu1 }
 0x1e0   : > { %v1400_v33 = vmul.f32 0.2, %v1380_v29  ;;  %v1340_v37 = vadd.f32 %v2659_v50, %v1339_v15  ;;  %v1911_v40 = vpop.f32.mrb[6].mxu0  ;;  %v1383_v11 = vadd.f32 %v1919_v27, %v2659_v50  ;;  %v1374_v31 = vpop.f32.mrb[7].mxu1 }
 0x1e1   : > { %v1392_v35 = vmul.f32 0.2, %v1348_v26  ;;  %v1398_v5 = vmul.f32 0.2, %v1372_v2  ;;  %v1351_v38 = vadd.f32 %v1911_v40, %v2659_v50  ;;  %v1342_v41 = vpop.f32.mrb[7].mxu0  ;;  %v1375_v43 = vadd.f32 %v2659_v50, %v1374_v31 }
 0x1e2   : > { %v1390_v9 = vmul.f32 0.2, %v1340_v37  ;;  %v1401_v42 = vmul.f32 0.2, %v1383_v11  ;;  %v1343_v14 = vadd.f32 %v2659_v50, %v1342_v41  ;;  %v1416_v47 = vmax.f32 %v1380_v29, %v1400_v33 }
 0x1e3   : > { %v1393_v44 = vmul.f32 0.2, %v1351_v38  ;;  %v1399_v46 = vmul.f32 0.2, %v1375_v43  ;;  %v1408_v49 = vmax.f32 %v1348_v26, %v1392_v35  ;;  %v1414_v52 = vmax.f32 %v1372_v2, %v1398_v5 }
 0x1e4   : > { %v1417_v48 = vmax.f32 %v1383_v11, %v1401_v42  ;;  %v1391_v45 = vmul.f32 0.2, %v1343_v14  ;;  %v1406_v56 = vmax.f32 %v1340_v37, %v1390_v9 }
 0x1e5   : > { %v1409_v53 = vmax.f32 %v1351_v38, %v1393_v44  ;;  %v1415_v55 = vmax.f32 %v1375_v43, %v1399_v46 }
 0x1e6   : > { %v1878_v34 = vpack.c.bf16 %v1417_v48, %v1416_v47  ;;  %v1407_v4 = vmax.f32 %v1343_v14, %v1391_v45 }
 0x1e7   : > { %v1858_v36 = vpack.c.bf16 %v1409_v53, %v1408_v49  ;;  %v1873_v58 = vpack.c.bf16 %v1415_v55, %v1414_v52 }
 0x1e8   : > { %1886 = vst [vmem:[%s2673_s26 + $0x38] sm:$0xff] %v1878_v34   ;;  %v1853_v59 = vpack.c.bf16 %v1407_v4, %v1406_v56 }
 0x1e9   : > { %1882 = vst [vmem:[%s2673_s26 + $0x18] sm:$0xff] %v1858_v36   ;;  %1885 = vst [vmem:[%s2673_s26 + $0x30] sm:$0xff] %v1873_v58  }
 0x1ea   : > { %1881 = vst [vmem:[%s2673_s26 + $0x10] sm:$0xff] %v1853_v59  }
 0x1eb PF: > { %s13_s16 = sadd.s32 1, %s2090_s16   ;;  %s2710_s12 = smov %s2082_s14 }
 0x1ec   : > { %p10_p7 = scmp.ge.s32.totalorder %s13_s16, 6   ;;  %s2711_s13 = smov %s2086_s15 }
 0x1ed   : > { %s2712_s14 = smov %s2715_s17  ;;  %s2713_s15 = smov %s2719_s18 }
 0x1ee   :  { %12 = sbr.rel (!%p10_p7) target bundleno = 3 (0x3), region = 71 }

</bundles_post_ra>
